<compile_context>
chip_gen: v6e
topology: v6e:2x2x1
jax: 0.10.0
libtpu: 0.0.40
codegen_flags: <defaults>
</compile_context>

<pallas_src>
import functools
import math

import jax
import jax.numpy as jnp
from jax import lax
from jax.experimental import pallas as pl
from jax.experimental.pallas import tpu as pltpu


def _round_up(x: int, m: int) -> int:
    return (x + m - 1) // m * m


def _suppress_kernel(x_ref, w1_ref, b1_ref, w2_ref, b2_ref, o_ref, *, eps):
    """Fused SuppressNet forward on one tile of rows.

    Orientation: rows (= (sample, class) pairs) live on the LANE axis so every
    op is lane-dense and the output store is an unmasked full-lane store.

      x  : (T, TM)    T = segment length (sublanes), TM = rows in this tile
      w1 : (2T, T)    mlp1 weight, PyTorch (out, in) layout
      b1 : (2T, 1)
      w2 : (2T, 1)    mlp2 weight as a column
      b2 : (1,)       SMEM scalar
      o  : (1, TM)    sigmoid output, one value per row
    """
    x = x_ref[...].astype(jnp.float32)

    # InstanceNorm1d (affine=False, eval): per-row mean / biased variance over
    # the segment dim (axis 0 here => sublane reduction), eps = 1e-5.
    mean = jnp.mean(x, axis=0, keepdims=True)
    xc = x - mean
    var = jnp.mean(xc * xc, axis=0, keepdims=True)
    xn = xc * lax.rsqrt(var + eps)

    # mlp1 + ReLU: (2T, T) @ (T, TM) -> (2T, TM); N = TM is lane-dense.
    w1 = w1_ref[...].astype(jnp.float32)
    h = jnp.dot(w1, xn, preferred_element_type=jnp.float32)
    h = jnp.maximum(h + b1_ref[...].astype(jnp.float32), 0.0)

    # mlp2 (2T -> 1) as a sublane reduction (no N=1 sliver matmul), + sigmoid.
    y = jnp.sum(h * w2_ref[...].astype(jnp.float32), axis=0, keepdims=True)
    y = y + b2_ref[0].astype(jnp.float32)
    o_ref[...] = jax.nn.sigmoid(y)


def suppress_forward(params, inputs, *, eps=1e-5, block_rows=1024):
    """SuppressNet forward. inputs: (B, segment_size, n_class) -> (B, n_class).

    `inputs` may be float32 or bfloat16; compute is always f32 in-kernel.
    """
    B, T, C = inputs.shape
    M = B * C

    # Put the (sample, class) rows on the minor (lane) axis: (B,T,C) -> (T, B*C).
    # TODO(synk): fold this relayout into the kernel to save one HBM pass.
    xt = jnp.transpose(inputs, (1, 0, 2)).reshape(T, M)

    # Row-tile size: lane-dense (multiple of 128), capped by block_rows.
    tm = min(_round_up(block_rows, 128), _round_up(M, 128))
    m_pad = _round_up(M, tm)
    if m_pad != M:
        # Zero-padded rows stay finite (var + eps > 0) and are sliced off below.
        xt = jnp.pad(xt, ((0, 0), (0, m_pad - M)))

    w1, b1, w2, b2 = params['w1'], params['b1'], params['w2'], params['b2']
    n_emb = w1.shape[0]

    itemsize = jnp.dtype(inputs.dtype).itemsize
    cost = pl.CostEstimate(
        flops=int(M * (4 * T * T + 9 * T)),
        transcendentals=int(3 * M),
        bytes_accessed=int(m_pad * T * itemsize + m_pad * 4 +
                           (w1.size + b1.size + w2.size + b2.size) * 4),
    )

    out = pl.pallas_call(
        functools.partial(_suppress_kernel, eps=eps),
        out_shape=jax.ShapeDtypeStruct((1, m_pad), jnp.float32),
        grid=(m_pad // tm,),
        in_specs=[
            pl.BlockSpec((T, tm), lambda i: (0, i)),             # x row tiles (pipelined)
            pl.BlockSpec((n_emb, T), lambda i: (0, 0)),          # w1, resident
            pl.BlockSpec((n_emb, 1), lambda i: (0, 0)),          # b1, resident
            pl.BlockSpec((n_emb, 1), lambda i: (0, 0)),          # w2, resident
            pl.BlockSpec(memory_space=pltpu.MemorySpace.SMEM),   # b2 scalar
        ],
        out_specs=pl.BlockSpec((1, tm), lambda i: (0, i)),       # lane-dense output
        compiler_params=pltpu.CompilerParams(
            dimension_semantics=("parallel",)),
        cost_estimate=cost,
    )(xt, w1, b1, w2, b2)

    # Column m corresponds to (b, c) = (m // C, m % C)  (matches permute(0,2,1)).
    return out[0, :M].reshape(B, C)


def init_params(key, opt):
    """Matches PyTorch nn.Linear default init (uniform +/- 1/sqrt(fan_in)).
    Weights kept in (out, in) layout; mlp2 weight stored as a (2T, 1) column."""
    n_seglen = opt['segment_size']
    n_emb = 2 * n_seglen
    k1, k2, k3, k4 = jax.random.split(key, 4)
    s1 = 1.0 / math.sqrt(n_seglen)
    s2 = 1.0 / math.sqrt(n_emb)
    return dict(
        w1=jax.random.uniform(k1, (n_emb, n_seglen), jnp.float32, -s1, s1),
        b1=jax.random.uniform(k2, (n_emb, 1), jnp.float32, -s1, s1),
        w2=jax.random.uniform(k3, (n_emb, 1), jnp.float32, -s2, s2),
        b2=jax.random.uniform(k4, (1,), jnp.float32, -s2, s2),
    )


def suppress_forward_ref(params, inputs, *, eps=1e-5):
    """Pure-JAX reference (mirrors the PyTorch forward), for correctness check."""
    x = jnp.transpose(inputs, (0, 2, 1)).astype(jnp.float32)     # (B, C, T)
    mean = jnp.mean(x, axis=-1, keepdims=True)
    xc = x - mean
    var = jnp.mean(xc * xc, axis=-1, keepdims=True)
    xn = xc * lax.rsqrt(var + eps)
    h = jnp.maximum(jnp.einsum('bct,et->bce', xn, params['w1'])
                    + params['b1'][:, 0], 0.0)
    y = jnp.einsum('bce,e->bc', h, params['w2'][:, 0]) + params['b2'][0]
    return jax.nn.sigmoid(y)


if __name__ == "__main__":
    opt = {'num_of_class': 5, 'segment_size': 16}
    n_class = opt['num_of_class'] - 1        # 4
    n_seglen = opt['segment_size']           # 16

    key = jax.random.PRNGKey(0)
    pkey, xkey = jax.random.split(key)
    params = init_params(pkey, opt)

    B = 2
    inputs = jax.random.normal(xkey, (B, n_seglen, n_class), jnp.float32)

    fwd = jax.jit(suppress_forward)
    out = jax.block_until_ready(fwd(params, inputs))

    ref = suppress_forward_ref(params, inputs)
    assert out.shape == (B, n_class)
    assert bool(jnp.all(jnp.isfinite(out)))
    assert bool(jnp.all((out >= 0.0) & (out <= 1.0)))
    assert bool(jnp.max(jnp.abs(out - ref)) < 2e-2), "mismatch vs JAX reference"
    print("KERNEL_OK")
</pallas_src>

<mosaic_0001>
module attributes {stable_mosaic.version = 11 : i64} {
  func.func @_suppress_kernel(%arg0: i32, %arg1: memref<16x128xf32, #tpu.memory_space<vmem>>, %arg2: memref<32x16xf32, #tpu.memory_space<vmem>>, %arg3: memref<32x1xf32, #tpu.memory_space<vmem>>, %arg4: memref<32x1xf32, #tpu.memory_space<vmem>>, %arg5: memref<1xf32, #tpu.memory_space<smem>>, %arg6: memref<1x128xf32, #tpu.memory_space<vmem>>) attributes {dimension_semantics = [#tpu.dimension_semantics<parallel>], iteration_bounds = array<i64: 1>, scalar_prefetch = 0 : i64, scratch_operands = 0 : i64, tpu.core_type = #tpu.core_type<tc>, window_params = [{transform_indices = @transform_0, window_bounds = array<i64: 16, 128>}, {pipeline_mode = #tpu.pipeline_mode<synchronous>, transform_indices = @transform_1, window_bounds = array<i64: 32, 16>}, {pipeline_mode = #tpu.pipeline_mode<synchronous>, transform_indices = @transform_2, window_bounds = array<i64: 32, 1>}, {pipeline_mode = #tpu.pipeline_mode<synchronous>, transform_indices = @transform_3, window_bounds = array<i64: 32, 1>}, {transform_indices = @transform_4, window_bounds = array<i64: 1>}, {transform_indices = @transform_5, window_bounds = array<i64: 1, 128>}]} {
    %c0 = arith.constant 0 : index
    %c0_0 = arith.constant 0 : index
    %0 = vector.load %arg1[%c0, %c0_0] : memref<16x128xf32, #tpu.memory_space<vmem>>, vector<16x128xf32>
    %cst = arith.constant dense<0.000000e+00> : vector<128xf32>
    %1 = vector.multi_reduction <add>, %0, %cst [0] : vector<16x128xf32> to vector<128xf32>
    %2 = vector.shape_cast %1 : vector<128xf32> to vector<1x128xf32>
    %cst_1 = arith.constant 1.600000e+01 : f32
    %3 = vector.broadcast %cst_1 : f32 to vector<1x128xf32>
    %4 = arith.divf %2, %3 : vector<1x128xf32>
    %5 = vector.broadcast %4 : vector<1x128xf32> to vector<16x128xf32>
    %6 = arith.subf %0, %5 : vector<16x128xf32>
    %7 = arith.mulf %6, %6 : vector<16x128xf32>
    %cst_2 = arith.constant dense<0.000000e+00> : vector<128xf32>
    %8 = vector.multi_reduction <add>, %7, %cst_2 [0] : vector<16x128xf32> to vector<128xf32>
    %9 = vector.shape_cast %8 : vector<128xf32> to vector<1x128xf32>
    %cst_3 = arith.constant 1.600000e+01 : f32
    %10 = vector.broadcast %cst_3 : f32 to vector<1x128xf32>
    %11 = arith.divf %9, %10 : vector<1x128xf32>
    %cst_4 = arith.constant 9.99999974E-6 : f32
    %12 = vector.broadcast %cst_4 : f32 to vector<1x128xf32>
    %13 = arith.addf %11, %12 : vector<1x128xf32>
    %14 = math.rsqrt %13 : vector<1x128xf32>
    %15 = vector.broadcast %14 : vector<1x128xf32> to vector<16x128xf32>
    %16 = arith.mulf %6, %15 : vector<16x128xf32>
    %c0_5 = arith.constant 0 : index
    %c0_6 = arith.constant 0 : index
    %17 = vector.load %arg2[%c0_5, %c0_6] : memref<32x16xf32, #tpu.memory_space<vmem>>, vector<32x16xf32>
    %cst_7 = arith.constant dense<0.000000e+00> : vector<32x128xf32>
    %18 = tpu.matmul %17, %16, %cst_7 {dimension_numbers = #tpu.dot_dimension_numbers<[1], [0], [0], [1], [0, 0, 1, 1], [], []>} : vector<32x16xf32>, vector<16x128xf32>, vector<32x128xf32> -> vector<32x128xf32>
    %c0_8 = arith.constant 0 : index
    %c0_9 = arith.constant 0 : index
    %19 = vector.load %arg3[%c0_8, %c0_9] : memref<32x1xf32, #tpu.memory_space<vmem>>, vector<32x1xf32>
    %20 = vector.broadcast %19 : vector<32x1xf32> to vector<32x128xf32>
    %21 = arith.addf %18, %20 : vector<32x128xf32>
    %cst_10 = arith.constant 0.000000e+00 : f32
    %22 = vector.broadcast %cst_10 : f32 to vector<32x128xf32>
    %23 = arith.maximumf %21, %22 : vector<32x128xf32>
    %c0_11 = arith.constant 0 : index
    %c0_12 = arith.constant 0 : index
    %24 = vector.load %arg4[%c0_11, %c0_12] : memref<32x1xf32, #tpu.memory_space<vmem>>, vector<32x1xf32>
    %25 = vector.broadcast %24 : vector<32x1xf32> to vector<32x128xf32>
    %26 = arith.mulf %23, %25 : vector<32x128xf32>
    %cst_13 = arith.constant dense<0.000000e+00> : vector<128xf32>
    %27 = vector.multi_reduction <add>, %26, %cst_13 [0] : vector<32x128xf32> to vector<128xf32>
    %28 = vector.shape_cast %27 : vector<128xf32> to vector<1x128xf32>
    %c0_14 = arith.constant 0 : index
    %29 = memref.load %arg5[%c0_14] : memref<1xf32, #tpu.memory_space<smem>>
    %30 = vector.broadcast %29 : f32 to vector<1x128xf32>
    %31 = arith.addf %28, %30 : vector<1x128xf32>
    %32 = arith.negf %31 : vector<1x128xf32>
    %33 = math.exp %32 : vector<1x128xf32>
    %cst_15 = arith.constant 1.000000e+00 : f32
    %34 = vector.broadcast %cst_15 : f32 to vector<1x128xf32>
    %35 = arith.addf %34, %33 : vector<1x128xf32>
    %36 = arith.divf %34, %35 : vector<1x128xf32>
    %c0_16 = arith.constant 0 : index
    %c0_17 = arith.constant 0 : index
    %37 = vector.load %arg6[%c0_16, %c0_17] : memref<1x128xf32, #tpu.memory_space<vmem>>, vector<1x128xf32>
    tpu.vector_store %arg6[%c0_16, %c0_17], %36 {strides = array<i32>} : memref<1x128xf32, #tpu.memory_space<vmem>>, vector<1x128xf32>,
    return
  }
  func.func @transform_0(%arg0: i32) -> (i32, i32) {
    %c0_i32 = arith.constant 0 : i32
    %c0_i32_0 = arith.constant 0 : i32
    return %c0_i32, %arg0 : i32, i32
  }
  func.func @transform_1(%arg0: i32) -> (i32, i32) {
    %c0_i32 = arith.constant 0 : i32
    %c0_i32_0 = arith.constant 0 : i32
    %c0_i32_1 = arith.constant 0 : i32
    return %c0_i32, %c0_i32_0 : i32, i32
  }
  func.func @transform_2(%arg0: i32) -> (i32, i32) {
    %c0_i32 = arith.constant 0 : i32
    %c0_i32_0 = arith.constant 0 : i32
    %c0_i32_1 = arith.constant 0 : i32
    return %c0_i32, %c0_i32_0 : i32, i32
  }
  func.func @transform_3(%arg0: i32) -> (i32, i32) {
    %c0_i32 = arith.constant 0 : i32
    %c0_i32_0 = arith.constant 0 : i32
    %c0_i32_1 = arith.constant 0 : i32
    return %c0_i32, %c0_i32_0 : i32, i32
  }
  func.func @transform_4(%arg0: i32) -> i32 {
    %c0_i32 = arith.constant 0 : i32
    %c0_i32_0 = arith.constant 0 : i32
    return %c0_i32 : i32
  }
  func.func @transform_5(%arg0: i32) -> (i32, i32) {
    %c0_i32 = arith.constant 0 : i32
    %c0_i32_0 = arith.constant 0 : i32
    return %c0_i32, %arg0 : i32, i32
  }
}

</mosaic_0001>

<bundles_post_ra>
// kernel: squeeze.1
= control target key start
LH: loop header
LB: loop body
LE: loop exit
PB: predicated region body
PF: predicated region fallthrough
CT: control target
= control target key end

     0   :  { %s77_s0 = inlined_call_operand.vmem [shape: f32[8], index: 0, kind: input, shape index: {}]   ;;  %s78_s1 = inlined_call_operand.hbm [shape: f32[2,4], index: 1, kind: output, shape index: {}]  }
   0x1   :  { %v6_v0 = vld [vmem:[%s77_s0] sm:$0x1] }
   0x2   :  { %2 = vsyncpa [#allocation1], 0  ;;  %7 = vst [vmem:[#allocation3] sm:$0x1] %v6_v0  ;;  %vm9_vm0 = vcmask 31744   ;;  %s59_s0 = smov 124  }
   0x3   :  { %s60_s8 = smov [#allocation0]  }
   0x4   :  { %s29_s9 = sshll.u32 %s60_s8, 4  ;;  %s30_s9 = int_to_ptr.vmem [resolvable:$true] %s29_s9 }
   0x5   :  { %s37_s10 = scalar_lea.vmem %s30_s9, 32  ;;  %p42_p1 = scmp.lt.s32.totalorder %s30_s9, %s30_s9 }
   0x6   :  { %p38_p0 = scmp.ne.s32.totalorder %s30_s9, %s37_s10  ;;  %p43_p2 = scmp.lt.s32.totalorder %s37_s10, %s37_s10 }
   0x8   :  { %p44_p3 = por %p43_p2, %p42_p1 }
   0x9   :  { %v11_v1 = vld [vmem:[#allocation3] sm:$0x1]  }
   0xa   :  { %v8_v2 = vld [vmem:[#allocation3] sm:$0x1]   ;;  %12 = vrot.lane.b32.xlu0 %v11_v1, %s59_s0  ;;  %p45_p4 = pnand %p44_p3, %p38_p0 }
   0xb   :  { %10 = vst.msk [vmem:[#allocation2] sm:$0x1] %vm9_vm0, %v8_v2  }
  0x7c   :  { %v13_v3 = vpop.permute.xlu0 %12  }
  0x7d   :  { %16 = vst.msk [vmem:[#allocation2 + $0x1] sm:$0x1] %vm9_vm0, %v13_v3  }
  0x84   :  { %v21_v4 = vld [vmem:[#allocation2] sm:$0x3] }
  0x85   :  { %24 = vst [vmem:[#allocation0] sm:$0x3] %v21_v4 }
  0x86   :  { %48 = shalt.err (!%p45_p4)
}
  0x87   :  { %32 = dma.vmem_to_hbm [thread:$0]  %s30_s9, 32, %s78_s1, [#allocation1]  }
  0x88   :  { %57 = dma.done.wait [#allocation1], 32  }
  0x89   :  { %58 = vsyncadd [#allocation1], 4294967264 }
  0x8a   :  { %34 = vsyncpa [#allocation1], 1 }

// kernel: suppress_forward.1
= control target key start
LH: loop header
LB: loop body
LE: loop exit
PB: predicated region body
PF: predicated region fallthrough
CT: control target
= control target key end

     0   :  { %vm76_vm0 = vcmask 130048   ;;  %v263_v3 = vmov 0   ;;  %s346_s0 = inlined_call_operand.vmem [shape: f32[16,128], index: 0, kind: input, shape index: {}]   ;;  %s347_s1 = inlined_call_operand.vmem [shape: f32[32,16], index: 1, kind: input, shape index: {}]   ;;  %s348_s2 = inlined_call_operand.vmem [shape: f32[32,1], index: 2, kind: input, shape index: {}]   ;;  %s349_s3 = inlined_call_operand.vmem [shape: f32[32,1], index: 3, kind: input, shape index: {}]   ;;  %s350_s4 = inlined_call_operand.<no memory space> [shape: f32[1], index: 4, kind: input, shape index: {}]   ;;  %s351_s5 = inlined_call_operand.vmem [shape: f32[1,128], index: 5, kind: output, shape index: {}]  }
   0x1   :  { %v21_v0 = vld [vmem:[%s346_s0] sm:$0xff]  ;;  %v22_v1 = vld [vmem:[%s346_s0 + $0x8] sm:$0xff]  ;;  %255 = vset.pattern.permute.xlu0 %v263_v3  ;;  %256 = vset.pattern.permute.xlu1 %v263_v3  ;;  %v50_v5 = vld [vmem:[%s347_s1 + $0x10] sm:$0xff] }
   0x2   :  { %v48_v2 = vld [vmem:[%s347_s1] sm:$0xff]  ;;  %v23_v4 = vadd.f32 %v22_v1, %v21_v0  ;;  %247 = vmatprep.mubr.msk.f32.mxu1 %vm76_vm0, %v50_v5  ;;  %v54_v7 = vld [vmem:[%s348_s2 + $0x10] sm:$0xff]  ;;  %v53_v9 = vld [vmem:[%s348_s2 + $0x8] sm:$0xff] }
   0x3   :  { %244 = vmatprep.mubr.msk.f32.mxu0 %vm76_vm0, %v48_v2  ;;  %v52_v6 = vld [vmem:[%s348_s2] sm:$0xff]  ;;  %68 = vperm.xlu1 %256, %v54_v7   ;;  %v55_v10 = vld [vmem:[%s348_s2 + $0x18] sm:$0xff]  ;;  %v179_v14 = vld [vmem:[%s349_s3 + $0x8] sm:$0xff]  ;;  %v216_v7 = vstv %s350_s4 }
   0x4   :  { %v24_v8 = vrot.slane %v23_v4, 4  ;;  %58 = vperm.xlu0 %255, %v52_v6   ;;  %v178_v13 = vld [vmem:[%s349_s3] sm:$0xff]  ;;  %v180_v17 = vld [vmem:[%s349_s3 + $0x10] sm:$0xff]  ;;  %v181_v18 = vld [vmem:[%s349_s3 + $0x18] sm:$0xff] }
   0x5   :  { %v49_v37 = vld [vmem:[%s347_s1 + $0x8] sm:$0xff]  ;;  %v51_v38 = vld [vmem:[%s347_s1 + $0x18] sm:$0xff] }
   0x6   :  { %v25_v11 = vadd.f32 %v24_v8, %v23_v4 }
   0x7   :  { %73 = vperm.xlu1 %256, %v55_v10  }
   0x8   :  { %v26_v12 = vrot.slane %v25_v11, 2  ;;  %63 = vperm.xlu0 %255, %v53_v9  }
   0xa   :  { %v27_v15 = vadd.f32 %v26_v12, %v25_v11 }
   0xb   :  { %189 = vperm.xlu1 %256, %v179_v14  }
   0xc   :  { %v28_v16 = vrot.slane %v27_v15, 1  ;;  %184 = vperm.xlu0 %255, %v178_v13  }
   0xe   :  { %v29_v19 = vadd.f32 %v28_v16, %v27_v15 }
   0xf   :  { %199 = vperm.xlu1 %256, %v181_v18  }
  0x10   :  { %v31_v20 = vmul.f32 0.0625, %v29_v19  ;;  %194 = vperm.xlu0 %255, %v180_v17  }
  0x12   :  { %v32_v21 = vsub.f32 %v21_v0, %v31_v20  ;;  %v33_v22 = vsub.f32 %v22_v1, %v31_v20 }
  0x14   :  { %v34_v23 = vmul.f32 %v32_v21, %v32_v21  ;;  %v35_v24 = vmul.f32 %v33_v22, %v33_v22 }
  0x16   :  { %v36_v25 = vadd.f32 %v35_v24, %v34_v23 }
  0x18   :  { %v37_v26 = vrot.slane %v36_v25, 4 }
  0x1a   :  { %v38_v27 = vadd.f32 %v37_v26, %v36_v25 }
  0x1c   :  { %v39_v28 = vrot.slane %v38_v27, 2 }
  0x1e   :  { %v40_v29 = vadd.f32 %v39_v28, %v38_v27 }
  0x20   :  { %v41_v30 = vrot.slane %v40_v29, 1 }
  0x22   :  { %v42_v31 = vadd.f32 %v41_v30, %v40_v29 }
  0x24   :  { %v43_v32 = vmul.f32 0.0625, %v42_v31 }
  0x26   :  { %v44_v33 = vadd.f32 1e-05, %v43_v32 }
  0x28   :  { %257 = vrsqrt.f32 %v44_v33 }
  0x35   :  { %v258_v34 = vpop.eup %257 }
  0x36   :  { %v47_v35 = vmul.f32 %v258_v34, %v33_v22  ;;  %v46_v36 = vmul.f32 %v258_v34, %v32_v21 }
  0x38   :  { %240 = vmatprep.subr.mxu0 %v47_v35  ;;  %250 = vmatprep.subr.mxu1 %v47_v35 }
  0x39   :  { %241 = vmatpush3.msra.mxu0 %v47_v35  ;;  %252 = vmatpush3.msra.mxu1 %v47_v35 }
  0x3a   :  { %242 = vmatprep.subr.mxu0 %v46_v36  ;;  %251 = vmatprep.subr.mxu1 %v46_v36 }
  0x3b   :  { %243 = vmatpush3.msra.mxu0 %v46_v36  ;;  %253 = vmatpush3.msra.mxu1 %v46_v36 }
  0x3c   :  { %245 = vmatmul.mubr.msk.f32.vlgmr.msra.gmra.mxu0 %vm76_vm0, %v49_v37  ;;  %248 = vmatmul.mubr.msk.f32.vlgmr.msra.gmra.mxu1 %vm76_vm0, %v51_v38 }
  0x7e   :  { %v69_v40 = vpop.permute.xlu1 %68 }
  0x7f   :  { %v59_v39 = vpop.permute.xlu0 %58 }
  0x82   :  { %v74_v42 = vpop.permute.xlu1 %73 }
  0x83   :  { %v64_v41 = vpop.permute.xlu0 %63 }
  0x86   :  { %v190_v53 = vpop.permute.xlu1 %189 }
  0x87   :  { %v185_v45 = vpop.permute.xlu0 %184 }
  0x8a   :  { %v200_v62 = vpop.permute.xlu1 %199 }
  0x8b   :  { %v195_v59 = vpop.permute.xlu0 %194 }
  0xfc   :  { %v246_v43 = vpop.f32.mrf.mxu0  ;;  %v249_v44 = vpop.f32.mrf.mxu1 }
  0xfd   :  { %v161_v46 = vadd.f32 %v246_v43, %v64_v41  ;;  %v171_v50 = vadd.f32 %v249_v44, %v74_v42 }
  0xfe   :  { %v155_v47 = vpop.f32.mrf.mxu0  ;;  %v165_v48 = vpop.f32.mrf.mxu1 }
  0xff   :  { %v175_v49 = vmax.f32 %v161_v46, 0.0  ;;  %v156_v51 = vadd.f32 %v155_v47, %v59_v39  ;;  %v166_v52 = vadd.f32 %v165_v48, %v69_v40  ;;  %v177_v57 = vmax.f32 %v171_v50, 0.0 }
 0x101   :  { %v174_v54 = vmax.f32 %v156_v51, 0.0  ;;  %v176_v55 = vmax.f32 %v166_v52, 0.0  ;;  %v203_v56 = vmul.f32 %v190_v53, %v175_v49  ;;  %v205_v63 = vmul.f32 %v200_v62, %v177_v57 }
 0x103   :  { %v202_v58 = vmul.f32 %v185_v45, %v174_v54  ;;  %v204_v61 = vmul.f32 %v195_v59, %v176_v55 }
 0x105   :  { %v206_v60 = vadd.f32 %v203_v56, %v202_v58 }
 0x107   :  { %v207_v0 = vadd.f32 %v206_v60, %v204_v61 }
 0x109   :  { %v208_v1 = vadd.f32 %v207_v0, %v205_v63 }
 0x10b   :  { %v209_v2 = vrot.slane %v208_v1, 4 }
 0x10d   :  { %v210_v3 = vadd.f32 %v209_v2, %v208_v1 }
 0x10f   :  { %v211_v4 = vrot.slane %v210_v3, 2 }
 0x111   :  { %v212_v5 = vadd.f32 %v211_v4, %v210_v3 }
 0x113   :  { %v213_v6 = vrot.slane %v212_v5, 1 }
 0x115   :  { %v214_v8 = vadd.f32 %v213_v6, %v212_v5 }
 0x117   :  { %v217_v9 = vadd.f32 %v216_v7, %v214_v8 }
 0x119   :  { %v233_v10 = vmul.f32 -1.442695, %v217_v9 }
 0x11b   :  { %259 = vpow2.f32 %v233_v10 }
 0x128   :  { %v260_v11 = vpop.eup %259 }
 0x129   :  { %v221_v12 = vadd.f32 1.0, %v260_v11 }
 0x12b   :  { %261 = vrcp.f32 %v221_v12 }
 0x138   :  { %v262_v13 = vpop.eup %261 }
 0x139   :  { %224 = vst [vmem:[%s351_s5] sm:$0x1] %v262_v13 }

</bundles_post_ra>
